<compile_context>
chip_gen: v6e
topology: v6e:2x2x1
jax: 0.10.0
libtpu: 0.0.40
codegen_flags: <defaults>
</compile_context>

<pallas_src>
import functools

import jax
import jax.numpy as jnp
from jax.experimental import pallas as pl
from jax.experimental.pallas import tpu as pltpu

_LANES = 512                        # lane-dense cols for the fallback view
_TILE_BUDGET_BYTES = 2 << 20        # ~2 MiB tiles: ~85%+ of HBM roofline
_SINGLE_PASS_MAX_BYTES = 4 << 20    # <= 4 MiB slab -> whole-slab single pass
_SINGLE_PASS_VMEM_LIMIT = 32 << 20  # in + out + f32 temps of a 4 MiB slab
_TILED_VMEM_LIMIT = 40 << 20        # double-buffered 2 MiB tiles + temps


def _round_up(a: int, b: int) -> int:
    return ((a + b - 1) // b) * b


# ----------------------- single-pass path (small slabs) -----------------------
def _center_whole_kernel(x_ref, o_ref, *, inv_n):
    # astype is a no-op for f32 inputs; keeps f32 accumulation for bf16/f16.
    x = x_ref[...].astype(jnp.float32)
    mean = jnp.sum(x) * inv_n          # inv_n is a compile-time constant
    o_ref[...] = (x - mean).astype(o_ref.dtype)


def _center_single_pass(x2d, n_true: int, out_dtype):
    itemsize = jnp.dtype(x2d.dtype).itemsize
    return pl.pallas_call(
        functools.partial(_center_whole_kernel, inv_n=1.0 / float(n_true)),
        out_shape=jax.ShapeDtypeStruct(x2d.shape, out_dtype),
        in_specs=[pl.BlockSpec(x2d.shape, lambda: (0, 0),
                               memory_space=pltpu.VMEM)],
        out_specs=pl.BlockSpec(x2d.shape, lambda: (0, 0),
                               memory_space=pltpu.VMEM),
        compiler_params=pltpu.CompilerParams(
            vmem_limit_bytes=_SINGLE_PASS_VMEM_LIMIT),
        cost_estimate=pl.CostEstimate(flops=2 * x2d.size, transcendentals=0,
                                      bytes_accessed=2 * x2d.size * itemsize),
    )(x2d)


# ----------------------- tiled two-pass path (large slabs) --------------------
def _tile_sum_kernel(x_ref, s_ref, *, tile_rows, total_rows, need_mask):
    # One f32 partial sum per row-tile -> SMEM scalar output block.
    x = x_ref[...].astype(jnp.float32)
    if need_mask:
        # Ragged last tile: rows beyond the array hold unspecified data;
        # mask them out of the sum (jnp.where never propagates the garbage).
        row = jax.lax.broadcasted_iota(jnp.int32, x.shape, 0)
        x = jnp.where(row + pl.program_id(0) * tile_rows < total_rows, x, 0.0)
    s_ref[0] = jnp.sum(x)


def _tile_center_kernel(mean_ref, x_ref, o_ref):
    m = mean_ref[0, 0]
    # Ragged last output block: Pallas masks out-of-range writes automatically.
    o_ref[...] = (x_ref[...].astype(jnp.float32) - m).astype(o_ref.dtype)


def _center_tiled(x2d, n_true: int, out_dtype, tile_rows: int):
    rows, cols = x2d.shape
    num_tiles = pl.cdiv(rows, tile_rows)
    need_mask = (rows % tile_rows) != 0
    itemsize = jnp.dtype(x2d.dtype).itemsize

    # Pass 1: per-tile partial sums (independent -> "parallel" for 2-TC chips).
    partials = pl.pallas_call(
        functools.partial(_tile_sum_kernel, tile_rows=tile_rows,
                          total_rows=rows, need_mask=need_mask),
        out_shape=jax.ShapeDtypeStruct((num_tiles,), jnp.float32),
        grid=(num_tiles,),
        in_specs=[pl.BlockSpec((tile_rows, cols), lambda i: (i, 0))],
        out_specs=pl.BlockSpec((1,), lambda i: (i,), memory_space=pltpu.SMEM),
        compiler_params=pltpu.CompilerParams(
            dimension_semantics=("parallel",),
            vmem_limit_bytes=_TILED_VMEM_LIMIT),
        cost_estimate=pl.CostEstimate(flops=x2d.size, transcendentals=0,
                                      bytes_accessed=x2d.size * itemsize),
    )(x2d)
    mean = (jnp.sum(partials) / jnp.float32(n_true)).reshape(1, 1)

    # Pass 2: tiled x - mean; output layout identical (lane-dense) to the input.
    return pl.pallas_call(
        _tile_center_kernel,
        out_shape=jax.ShapeDtypeStruct((rows, cols), out_dtype),
        grid=(num_tiles,),
        in_specs=[pl.BlockSpec((1, 1), lambda i: (0, 0),
                               memory_space=pltpu.SMEM),
                  pl.BlockSpec((tile_rows, cols), lambda i: (i, 0))],
        out_specs=pl.BlockSpec((tile_rows, cols), lambda i: (i, 0)),
        compiler_params=pltpu.CompilerParams(
            dimension_semantics=("parallel",),
            vmem_limit_bytes=_TILED_VMEM_LIMIT),
        cost_estimate=pl.CostEstimate(flops=x2d.size, transcendentals=0,
                                      bytes_accessed=2 * x2d.size * itemsize),
    )(mean, x2d)


# ------------------------------- public wrapper -------------------------------
def layer1_forward(x, *, single_pass_max_bytes=_SINGLE_PASS_MAX_BYTES,
                   tile_budget_bytes=_TILE_BUDGET_BYTES):
    """x - x.mean()  (mean over all elements), matching PyTorch Layer1."""
    orig_shape = x.shape
    n = x.size
    itemsize = jnp.dtype(x.dtype).itemsize

    # Pick a 2-D (rows, cols) view of x.
    last = x.shape[-1] if x.ndim >= 1 else 1
    native = (x.ndim >= 2 and last % 128 == 0
              and last * itemsize * 8 <= tile_budget_bytes)
    if native:
        # Merge only the leading dims: layout-preserving, lane-dense last dim.
        cols = last
        x2d = x.reshape(n // cols, cols)
        padded = False
    else:
        # Fallback: flatten + zero-pad to a lane-dense (rows, 512) slab.
        cols = _LANES
        flat = x.reshape(-1)
        total = _round_up(max(n, 1), cols)
        padded = total != n
        if padded:
            flat = jnp.pad(flat, (0, total - n))
        x2d = flat.reshape(total // cols, cols)

    if x2d.size * itemsize <= single_pass_max_bytes:
        # Small slab: single VMEM block, one HBM read + one write.
        out2d = _center_single_pass(x2d, n, x.dtype)
    else:
        # Large slab: row-tiled reduce pass + subtract pass.
        rows = x2d.shape[0]
        tile_rows = max(((tile_budget_bytes // (cols * itemsize)) // 8) * 8, 8)
        tile_rows = min(tile_rows, _round_up(rows, 8))
        out2d = _center_tiled(x2d, n, x.dtype, tile_rows)

    if padded:
        return out2d.reshape(-1)[:n].reshape(orig_shape)
    return out2d.reshape(orig_shape)


layer1_forward_jit = jax.jit(layer1_forward)


if __name__ == "__main__":
    key = jax.random.PRNGKey(0)
    k1, k2, k3, k4 = jax.random.split(key, 4)

    # 1) Small NCHW activation (module spec shape): single-pass path,
    #    lane-dense (4, 512) view, no padding.
    x = jax.random.normal(k1, (2, 4, 16, 16), dtype=jnp.float32)
    out = jax.block_until_ready(layer1_forward_jit(x))
    ref = x - jnp.mean(x)
    assert out.shape == x.shape and out.dtype == x.dtype
    assert float(jnp.max(jnp.abs(out - ref))) < 1e-5

    # 2) Awkward size: exercises the zero-pad + tail-slice fallback view.
    x_odd = jax.random.normal(k2, (3, 5, 7), dtype=jnp.float32)
    out_odd = jax.block_until_ready(layer1_forward_jit(x_odd))
    ref_odd = x_odd - jnp.mean(x_odd)
    assert out_odd.shape == x_odd.shape
    assert float(jnp.max(jnp.abs(out_odd - ref_odd))) < 1e-5

    # 3) Tiled two-pass path with a ragged last tile (thresholds forced small
    #    so a ~0.5 MiB tensor exercises the masked-reduce / masked-write code).
    fwd_tiled = jax.jit(functools.partial(layer1_forward,
                                          single_pass_max_bytes=0,
                                          tile_budget_bytes=128 * 1024))
    x_rag = jax.random.normal(k3, (2, 525, 128), dtype=jnp.float32)
    out_rag = jax.block_until_ready(fwd_tiled(x_rag))
    ref_rag = x_rag - jnp.mean(x_rag)
    assert out_rag.shape == x_rag.shape
    assert float(jnp.max(jnp.abs(out_rag - ref_rag))) < 1e-4

    # 4) Default-threshold tiled path on a lane-dense activation (~8 MiB):
    #    native (no-relayout) view, exact (2048, 256) tiles, parallel grid.
    x_big = jax.random.normal(k4, (8, 8, 128, 256), dtype=jnp.float32)
    out_big = jax.block_until_ready(layer1_forward_jit(x_big))
    ref_big = x_big - jnp.mean(x_big)
    assert out_big.shape == x_big.shape
    assert float(jnp.max(jnp.abs(out_big - ref_big))) < 1e-4

    print("KERNEL_OK")
</pallas_src>

<mosaic_0001>
module attributes {stable_mosaic.version = 11 : i64} {
  func.func @_center_whole_kernel(%arg0: memref<4x512xf32, #tpu.memory_space<vmem>>, %arg1: memref<4x512xf32, #tpu.memory_space<vmem>>) attributes {dimension_semantics = [], scalar_prefetch = 0 : i64, scratch_operands = 0 : i64, tpu.core_type = #tpu.core_type<tc>} {
    %c0 = arith.constant 0 : index
    %c0_0 = arith.constant 0 : index
    %0 = vector.load %arg0[%c0, %c0_0] : memref<4x512xf32, #tpu.memory_space<vmem>>, vector<4x512xf32>
    %1 = vector.shape_cast %0 : vector<4x512xf32> to vector<1x4x512xf32>
    %cst = arith.constant dense<0.000000e+00> : vector<1xf32>
    %2 = vector.multi_reduction <add>, %1, %cst [1, 2] : vector<1x4x512xf32> to vector<1xf32>
    %3 = vector.shape_cast %2 : vector<1xf32> to vector<1x1x1xf32>
    %4 = vector.extract %3[0, 0, 0] : f32 from vector<1x1x1xf32>
    %cst_1 = arith.constant 4.8828125E-4 : f32
    %5 = arith.mulf %4, %cst_1 : f32
    %6 = vector.broadcast %5 : f32 to vector<4x512xf32>
    %7 = arith.subf %0, %6 : vector<4x512xf32>
    %c0_2 = arith.constant 0 : index
    %c0_3 = arith.constant 0 : index
    %8 = vector.load %arg1[%c0_2, %c0_3] : memref<4x512xf32, #tpu.memory_space<vmem>>, vector<4x512xf32>
    tpu.vector_store %arg1[%c0_2, %c0_3], %7 {strides = array<i32>} : memref<4x512xf32, #tpu.memory_space<vmem>>, vector<4x512xf32>,
    return
  }
}

</mosaic_0001>

<bundles_post_ra>
// kernel: layer1_forward.1
= control target key start
LH: loop header
LB: loop body
LE: loop exit
PB: predicated region body
PF: predicated region fallthrough
CT: control target
= control target key end

     0   :  { %vm16_vm0 = vcmask 1043456   ;;  %s69_s0 = inlined_call_operand.vmem [shape: f32[4,512], index: 0, kind: input, shape index: {}]   ;;  %s70_s1 = inlined_call_operand.vmem [shape: f32[4,512], index: 1, kind: output, shape index: {}]  }
   0x1   :  { %v8_v0 = vld [vmem:[%s69_s0] sm:$0xff]  ;;  %v9_v1 = vld [vmem:[%s69_s0 + $0x8] sm:$0xff] }
   0x2   :  { %v12_v2 = vcombine.high %v8_v0, %v8_v0  ;;  %v13_v3 = vcombine.high %v9_v1, %v9_v1  ;;  %v17_v4 = vsel %vm16_vm0, %v8_v0, 0.0  ;;  %v20_v6 = vsel %vm16_vm0, %v9_v1, 0.0 }
   0x4   :  { %v18_v5 = vsel %vm16_vm0, %v12_v2, 0.0  ;;  %v22_v8 = vsel %vm16_vm0, %v13_v3, 0.0 }
   0x5   :  { %v19_v7 = vadd.f32 %v18_v5, %v17_v4 }
   0x7   :  { %v21_v9 = vadd.f32 %v20_v6, %v19_v7 }
   0x9   :  { %v23_v10 = vadd.f32 %v22_v8, %v21_v9 }
   0xb   :  { %24 = vadd.xlane.f32.xlu0 %v23_v10 }
  0x94   :  { %v25_v11 = vpop.xlane.xlu0 %24 }
  0x95   :  { %v26_v12 = vrot.slane %v25_v11, 4 }
  0x97   :  { %v27_v13 = vadd.f32 %v26_v12, %v25_v11 }
  0x99   :  { %v28_v14 = vrot.slane %v27_v13, 2 }
  0x9b   :  { %v29_v15 = vadd.f32 %v28_v14, %v27_v13 }
  0x9d   :  { %v30_v16 = vrot.slane %v29_v15, 1 }
  0x9f   :  { %v31_v17 = vadd.f32 %v30_v16, %v29_v15 }
  0xa1   :  { %43 = vpush %v31_v17 }
  0xd2   :  { %s44_s10 = spop %43 }
  0xd3   :  { %s33_s0 = smul.f32 0.00048828125, %s44_s10 }
  0xd5   :  { %v34_v18 = vstv %s33_s0 }
  0xd6   :  { %v35_v19 = vsub.f32 %v8_v0, %v34_v18  ;;  %v36_v20 = vsub.f32 %v9_v1, %v34_v18 }
  0xd8   :  { %37 = vst [vmem:[%s70_s1] sm:$0xff] %v35_v19  ;;  %38 = vst [vmem:[%s70_s1 + $0x8] sm:$0xff] %v36_v20 }

</bundles_post_ra>
